<compile_context>
chip_gen: v7x
topology: tpu7x:2x2x1
jax: 0.10.0
libtpu: 0.0.40
codegen_flags: <defaults>
</compile_context>

<pallas_src>
import functools

import jax
import jax.numpy as jnp
from jax.experimental import pallas as pl
from jax.experimental.pallas import tpu as pltpu


def _round_up(n, m):
    return ((n + m - 1) // m) * m


# Scoped VMEM: keep the working set well under v7x's 64 MiB/TC (v5e/v6e have 128 MiB).
_VMEM_LIMIT_BYTES = 56 * 1024 * 1024
_VMEM_WORKING_SET_BUDGET = 40 * 1024 * 1024


def _concat_mlp_kernel(x_ref, w1_ref, b1_ref, wp_ref, out_ref, *, fuse_concat, in_dim):
    x = x_ref[...]                                        # [bm, in_dim] f32

    # out = activation(x); dropout is identity in eval mode.
    h = jnp.maximum(x, 0.0)                               # f32 VPU

    # out = self.linear(out)  -> bf16 x bf16 on the MXU, f32 accumulate.
    h = jnp.dot(h.astype(jnp.bfloat16), w1_ref[...],
                preferred_element_type=jnp.float32) + b1_ref[...]

    # out = self.projection(out)  (zero-initialized per module __init__).
    p = jnp.dot(h.astype(jnp.bfloat16), wp_ref[...],
                preferred_element_type=jnp.float32)

    if fuse_concat:
        # torch.cat((x, out), dim=-1): lane-aligned stores into disjoint column
        # ranges of the output tile (both halves are multiples of 128 wide).
        out_ref[:, :in_dim] = x
        out_ref[:, in_dim:] = p
    else:
        # Unaligned feature dims: emit only p; wrapper concatenates [x, p] once.
        out_ref[...] = p


def prepare_params(w1, b1, wp):
    """One-time parameter prep (call at init, not per forward).

    w1: [in_dim, latent] (pre-transposed, fan_in x fan_out), b1: [latent] or
    [1, latent], wp: [latent, latent] (pre-transposed). Weights are cast to
    bf16 once so the forward pass pays zero per-call conversion traffic.
    """
    w1 = jnp.asarray(w1, jnp.bfloat16)
    wp = jnp.asarray(wp, jnp.bfloat16)
    b1 = jnp.asarray(b1, jnp.float32).reshape(1, -1)
    return w1, b1, wp


def concat_mlp_forward(x, params, *, block_m=1024):
    """x: [bs, in_dim] float. params = prepare_params(w1, b1, wp).
    Returns [bs, in_dim + latent_dim] float32."""
    w1, b1, wp = params
    bs, in_dim = x.shape
    latent_dim = w1.shape[1]
    assert w1.shape == (in_dim, latent_dim)
    assert b1.shape == (1, latent_dim)
    assert wp.shape == (latent_dim, latent_dim)

    x = x.astype(jnp.float32)

    # Fused in-kernel concat only when both halves are lane (128) aligned;
    # otherwise the kernel writes just p and one XLA concat builds [x, p]
    # (avoids the old full-width write + re-read + strip pass).
    fuse_concat = (in_dim % 128 == 0) and (latent_dim % 128 == 0)
    out_cols = in_dim + latent_dim if fuse_concat else latent_dim

    # --- batch tile sizing ------------------------------------------------
    # Weights are single-buffered; x and out are double-buffered by the pipeline.
    weight_bytes = w1.size * 2 + b1.size * 4 + wp.size * 2
    per_row_bytes = 2 * in_dim * 4 + 2 * out_cols * 4
    bm_budget = max((_VMEM_WORKING_SET_BUDGET - weight_bytes) // per_row_bytes, 8)

    if bs <= 8:
        bm = bs                                   # one tile covers the whole batch
    else:
        bm = min(block_m, int(bm_budget))
        # Give v7x's second TensorCore work: aim for >= 2 grid steps.
        bm = min(bm, _round_up(pl.cdiv(bs, 2), 8))
        bm = max(8, (bm // 8) * 8)                # sublane-aligned tile

    bs_pad = _round_up(bs, bm)
    x_in = jnp.pad(x, ((0, bs_pad - bs), (0, 0))) if bs_pad != bs else x

    grid = (bs_pad // bm,)

    # --- pallas_call --------------------------------------------------------
    flops = 2 * bs_pad * (in_dim * latent_dim + latent_dim * latent_dim)
    bytes_accessed = bs_pad * in_dim * 4 + weight_bytes + bs_pad * out_cols * 4

    kernel = functools.partial(_concat_mlp_kernel,
                               fuse_concat=fuse_concat, in_dim=in_dim)

    out = pl.pallas_call(
        kernel,
        out_shape=jax.ShapeDtypeStruct((bs_pad, out_cols), jnp.float32),
        grid=grid,
        in_specs=[
            # x: tiled over batch (double-buffered by the pipeline).
            pl.BlockSpec((bm, in_dim), lambda i: (i, 0)),
            # Weights: constant index_map -> resident; single-buffered to halve
            # their VMEM footprint.
            pl.BlockSpec((in_dim, latent_dim), lambda i: (0, 0),
                         pipeline_mode=pl.Buffered(1)),
            pl.BlockSpec((1, latent_dim), lambda i: (0, 0),
                         pipeline_mode=pl.Buffered(1)),
            pl.BlockSpec((latent_dim, latent_dim), lambda i: (0, 0),
                         pipeline_mode=pl.Buffered(1)),
        ],
        out_specs=pl.BlockSpec((bm, out_cols), lambda i: (i, 0)),
        compiler_params=pltpu.CompilerParams(
            dimension_semantics=("parallel",),
            vmem_limit_bytes=_VMEM_LIMIT_BYTES),
        cost_estimate=pl.CostEstimate(
            flops=flops, transcendentals=0, bytes_accessed=bytes_accessed),
    )(x_in, w1, b1, wp)

    if bs_pad != bs:
        out = out[:bs]
    if fuse_concat:
        return out
    return jnp.concatenate([x, out], axis=-1)


def make_params(key, in_dim, latent_dim, *, zero_projection=True):
    """Shapes mirror the module; weights stored pre-transposed ([fan_in, fan_out])."""
    k1, k2, k3 = jax.random.split(key, 3)
    w1 = jax.random.normal(k1, (in_dim, latent_dim), jnp.float32) * 0.1
    b1 = jax.random.normal(k2, (1, latent_dim), jnp.float32) * 0.1
    if zero_projection:
        wp = jnp.zeros((latent_dim, latent_dim), jnp.float32)   # __zero_initial
    else:
        wp = jax.random.normal(k3, (latent_dim, latent_dim), jnp.float32) * 0.1
    return w1, b1, wp


def concat_mlp_reference(x, w1, b1, wp):
    """Pure-JAX reference mirroring the kernel's bf16-matmul / f32-accumulate."""
    x = x.astype(jnp.float32)
    h = jnp.maximum(x, 0.0)
    h = jnp.dot(h.astype(jnp.bfloat16), w1.astype(jnp.bfloat16),
                preferred_element_type=jnp.float32) + b1.reshape(1, -1)
    p = jnp.dot(h.astype(jnp.bfloat16), wp.astype(jnp.bfloat16),
                preferred_element_type=jnp.float32)
    return jnp.concatenate([x, p], axis=-1)


if __name__ == "__main__":
    key = jax.random.PRNGKey(0)
    kx, kp = jax.random.split(key)

    # Case 1: module-consistent small shapes (batch=16, in_dim=32, latent=32),
    # faithful zero-initialized projection, unaligned features -> XLA-concat path.
    bs, in_dim, latent_dim = 16, 32, 32
    x = jax.random.normal(kx, (bs, in_dim), jnp.float32)
    w1, b1, wp = make_params(kp, in_dim, latent_dim, zero_projection=True)
    params = prepare_params(w1, b1, wp)
    out = jax.block_until_ready(concat_mlp_forward(x, params))
    ref = concat_mlp_reference(x, w1, b1, wp)
    assert out.shape == (bs, in_dim + latent_dim)
    assert jnp.allclose(out, ref, atol=1e-4, rtol=1e-4)

    # Case 2: non-zero projection (as if trained) with the same small shapes.
    w1, b1, wp = make_params(kp, in_dim, latent_dim, zero_projection=False)
    params = prepare_params(w1, b1, wp)
    out = jax.block_until_ready(concat_mlp_forward(x, params))
    ref = concat_mlp_reference(x, w1, b1, wp)
    assert out.shape == (bs, in_dim + latent_dim)
    assert jnp.allclose(out, ref, atol=1e-4, rtol=1e-4)

    # Case 3: lane-aligned features (128/128) -> fused in-kernel concat path,
    # two grid steps (megacore on v7x).
    bs, in_dim, latent_dim = 32, 128, 128
    kx2, kp2 = jax.random.split(jax.random.PRNGKey(1))
    x = jax.random.normal(kx2, (bs, in_dim), jnp.float32)
    w1, b1, wp = make_params(kp2, in_dim, latent_dim, zero_projection=False)
    params = prepare_params(w1, b1, wp)
    out = jax.block_until_ready(concat_mlp_forward(x, params))
    ref = concat_mlp_reference(x, w1, b1, wp)
    assert out.shape == (bs, in_dim + latent_dim)
    assert jnp.allclose(out, ref, atol=1e-4, rtol=1e-4)

    print("KERNEL_OK")
</pallas_src>

<mosaic_0001>
module attributes {stable_mosaic.version = 11 : i64} {
  func.func @_concat_mlp_kernel(%arg0: i32, %arg1: memref<8x32xf32, #tpu.memory_space<vmem>>, %arg2: memref<32x32xbf16, #tpu.memory_space<vmem>>, %arg3: memref<1x32xf32, #tpu.memory_space<vmem>>, %arg4: memref<32x32xbf16, #tpu.memory_space<vmem>>, %arg5: memref<8x32xf32, #tpu.memory_space<vmem>>) attributes {dimension_semantics = [#tpu.dimension_semantics<parallel>], iteration_bounds = array<i64: 2>, scalar_prefetch = 0 : i64, scratch_operands = 0 : i64, tpu.core_type = #tpu.core_type<tc>, window_params = [{transform_indices = @transform_0, window_bounds = array<i64: 8, 32>}, {pipeline_mode = #tpu.pipeline_mode<synchronous>, transform_indices = @transform_1, window_bounds = array<i64: 32, 32>}, {pipeline_mode = #tpu.pipeline_mode<synchronous>, transform_indices = @transform_2, window_bounds = array<i64: 1, 32>}, {pipeline_mode = #tpu.pipeline_mode<synchronous>, transform_indices = @transform_3, window_bounds = array<i64: 32, 32>}, {transform_indices = @transform_4, window_bounds = array<i64: 8, 32>}]} {
    %c0 = arith.constant 0 : index
    %c0_0 = arith.constant 0 : index
    %0 = vector.load %arg1[%c0, %c0_0] : memref<8x32xf32, #tpu.memory_space<vmem>>, vector<8x32xf32>
    %cst = arith.constant 0.000000e+00 : f32
    %1 = vector.broadcast %cst : f32 to vector<8x32xf32>
    %2 = arith.maximumf %0, %1 : vector<8x32xf32>
    %3 = arith.truncf %2 : vector<8x32xf32> to vector<8x32xbf16>
    %c0_1 = arith.constant 0 : index
    %c0_2 = arith.constant 0 : index
    %4 = vector.load %arg2[%c0_1, %c0_2] : memref<32x32xbf16, #tpu.memory_space<vmem>>, vector<32x32xbf16>
    %cst_3 = arith.constant dense<0.000000e+00> : vector<8x32xf32>
    %5 = tpu.matmul %3, %4, %cst_3 {dimension_numbers = #tpu.dot_dimension_numbers<[1], [0], [0], [1], [0, 0, 1, 1], [], []>} : vector<8x32xbf16>, vector<32x32xbf16>, vector<8x32xf32> -> vector<8x32xf32>
    %c0_4 = arith.constant 0 : index
    %c0_5 = arith.constant 0 : index
    %6 = vector.load %arg3[%c0_4, %c0_5] : memref<1x32xf32, #tpu.memory_space<vmem>>, vector<1x32xf32>
    %7 = vector.broadcast %6 : vector<1x32xf32> to vector<8x32xf32>
    %8 = arith.addf %5, %7 : vector<8x32xf32>
    %9 = arith.truncf %8 : vector<8x32xf32> to vector<8x32xbf16>
    %c0_6 = arith.constant 0 : index
    %c0_7 = arith.constant 0 : index
    %10 = vector.load %arg4[%c0_6, %c0_7] : memref<32x32xbf16, #tpu.memory_space<vmem>>, vector<32x32xbf16>
    %cst_8 = arith.constant dense<0.000000e+00> : vector<8x32xf32>
    %11 = tpu.matmul %9, %10, %cst_8 {dimension_numbers = #tpu.dot_dimension_numbers<[1], [0], [0], [1], [0, 0, 1, 1], [], []>} : vector<8x32xbf16>, vector<32x32xbf16>, vector<8x32xf32> -> vector<8x32xf32>
    %c0_9 = arith.constant 0 : index
    %c0_10 = arith.constant 0 : index
    %12 = vector.load %arg5[%c0_9, %c0_10] : memref<8x32xf32, #tpu.memory_space<vmem>>, vector<8x32xf32>
    tpu.vector_store %arg5[%c0_9, %c0_10], %11 {strides = array<i32>} : memref<8x32xf32, #tpu.memory_space<vmem>>, vector<8x32xf32>,
    return
  }
  func.func @transform_0(%arg0: i32) -> (i32, i32) {
    %c0_i32 = arith.constant 0 : i32
    %c0_i32_0 = arith.constant 0 : i32
    return %arg0, %c0_i32 : i32, i32
  }
  func.func @transform_1(%arg0: i32) -> (i32, i32) {
    %c0_i32 = arith.constant 0 : i32
    %c0_i32_0 = arith.constant 0 : i32
    %c0_i32_1 = arith.constant 0 : i32
    return %c0_i32, %c0_i32_0 : i32, i32
  }
  func.func @transform_2(%arg0: i32) -> (i32, i32) {
    %c0_i32 = arith.constant 0 : i32
    %c0_i32_0 = arith.constant 0 : i32
    %c0_i32_1 = arith.constant 0 : i32
    return %c0_i32, %c0_i32_0 : i32, i32
  }
  func.func @transform_3(%arg0: i32) -> (i32, i32) {
    %c0_i32 = arith.constant 0 : i32
    %c0_i32_0 = arith.constant 0 : i32
    %c0_i32_1 = arith.constant 0 : i32
    return %c0_i32, %c0_i32_0 : i32, i32
  }
  func.func @transform_4(%arg0: i32) -> (i32, i32) {
    %c0_i32 = arith.constant 0 : i32
    %c0_i32_0 = arith.constant 0 : i32
    return %arg0, %c0_i32 : i32, i32
  }
}

</mosaic_0001>

<bundles_post_ra>
// kernel: tpu_custom_call.1
= control target key start
LH: loop header
LB: loop body
LE: loop exit
PB: predicated region body
PF: predicated region fallthrough
CT: control target
= control target key end

     0   :  { %9 = vsyncpa [#allocation3], 0  ;;  %s1027_s0 = inlined_call_operand.hbm [shape: f32[16,32], index: 0, kind: input, shape index: {}]   ;;  %s1028_s1 = inlined_call_operand.hbm [shape: bf16[32,32], index: 1, kind: input, shape index: {}]   ;;  %s1029_s2 = inlined_call_operand.vmem [shape: f32[1,32], index: 2, kind: input, shape index: {}]   ;;  %s1030_s3 = inlined_call_operand.hbm [shape: bf16[32,32], index: 3, kind: input, shape index: {}]   ;;  %s1031_s4 = inlined_call_operand.hbm [shape: f32[16,32], index: 4, kind: output, shape index: {}]  }
   0x1   :  { %11 = vsyncpa [#allocation3 + $0x1], 0 }
   0x2   :  { %12 = vsyncpa [#allocation6], 0 }
   0x3   :  { %13 = vsyncpa [#allocation4], 0 }
   0x4   :  { %15 = vsyncpa [#allocation4 + $0x1], 0  ;;  %s788_s15 = smov 0   ;;  %s790_s16 = smov 0  }
   0x5   :  { %s792_s17 = smov 0   ;;  %s794_s18 = smov 0  }
   0x6 LB: > { %s809_s19 = sadd.s32 4294967295, %s753_s18   ;;  %s477_s20 = sadd.s32 4294967294, %s753_s18   ;;  %s753_s18 = sphi %s794_s18, %s1051_s18   ;;  %s749_s17 = sphi %s792_s17, %s1050_s17   ;;  %s745_s16 = sphi %s790_s16, %s1049_s16   ;;  %s741_s15 = sphi %s788_s15, %s1048_s15  }
   0x7   : > { %p41_p0 = scmp.ne.s32.totalorder %s745_s16, %s741_s15  ;;  %p1032_p1 = scmp.eq.s32.totalorder %s809_s19, 0 }
   0x8   : > { %p134_p3 = scmp.eq.s32.totalorder %s477_s20, 1  ;;  %p478_p5 = scmp.ge.s32.totalorder %s753_s18, 1 }
   0x9   : > { %p818_p4 = por %p1032_p1, %p41_p0  ;;  %p141_p7 = scmp.lt.s32.totalorder %s753_s18, 3 }
   0xa   : > { %p823_p6 = por %p134_p3, %p41_p0  ;;  %s755_s24 = smov [#allocation5]  }
   0xb   : > { %s1035_s21 = scalar_select %p818_p4, 1, 0 }
   0xc   : > { %s1036_s22 = scalar_select %p823_p6, 1, 0 }
   0xd   : > { %p828_p8 = pnand %p478_p5, %p141_p7  ;;  %s153_s25 = sshll.u32 %s755_s24, 4  ;;  %s832_s25 = int_to_ptr.vmem [resolvable:$true] %s153_s25 }
   0xe   : > { %s756_s27 = smov [#allocation7]   ;;  %s597_s5 = scalar_lea.hbm %s1028_s1, 256 }
   0xf   : > { %p534_p9 = pneg %p828_p8  ;;  %s169_s28 = sshll.u32 %s756_s27, 4  ;;  %s843_s28 = int_to_ptr.vmem [resolvable:$true] %s169_s28 }
  0x10   : > { %p598_p12 = scmp.ne.s32.totalorder %s1028_s1, %s597_s5  ;;  %p604_p5 = scmp.lt.u32.totalorder %s597_s5, %s1028_s1 }
  0x11   : > { %p839_p11 = pnand %p534_p9, %p1032_p1 }
  0x13   : > { %p599_p13 = pneg %p839_p11 }
  0x15   : > { %p600_p0 = pnand %p599_p13, %p598_p12 }
  0x17   : > { %p601_p3 = pneg %p600_p0 }
  0x19   : > { %p606_p7 = pnand %p604_p5, %p601_p3 }
  0x1b   : > { %609 = shalt.err (!%p606_p7)
}
  0x1c   : > { %s610_s10 = scalar_lea.vmem %s832_s25, 256  ;;  %p618_p2 = scmp.lt.s32.totalorder %s832_s25, %s832_s25 }
  0x1d   : > { %p611_p9 = scmp.ne.s32.totalorder %s832_s25, %s610_s10  ;;  %p619_p12 = scmp.lt.s32.totalorder %s610_s10, %s610_s10 }
  0x1f   : > { %p613_p10 = pnand %p611_p9, %p599_p13  ;;  %p620_p0 = por %p619_p12, %p618_p2 }
  0x21   : > { %p614_p1 = pneg %p613_p10 }
  0x23   : > { %p621_p6 = pnand %p620_p0, %p614_p1 }
  0x25   : > { %624 = shalt.err (!%p621_p6)
}
  0x26   : > { %s757_s11 = smov 64   ;;  %s758_s12 = smov 4  }
  0x27   : > { %537 = dma.hbm_to_vmem [thread:$0]  (!%p839_p11), %s1028_s1, 256, %s832_s25, [#allocation6], %s757_s11, %s757_s11, %s758_s12  }
  0x28   : > { %s625_s27 = scalar_lea.hbm %s1030_s3, 256 }
  0x29   : > { %p626_p2 = scmp.ne.s32.totalorder %s1030_s3, %s625_s27  ;;  %p632_p10 = scmp.lt.u32.totalorder %s625_s27, %s1030_s3 }
  0x2b   : > { %p628_p1 = pnand %p626_p2, %p599_p13 }
  0x2d   : > { %p629_p6 = pneg %p628_p1 }
  0x2f   : > { %p634_p3 = pnand %p632_p10, %p629_p6 }
  0x31   : > { %637 = shalt.err (!%p634_p3)
}
  0x32   : > { %s638_s25 = scalar_lea.vmem %s843_s28, 256  ;;  %p646_p12 = scmp.lt.s32.totalorder %s843_s28, %s843_s28 }
  0x33   : > { %p639_p5 = scmp.ne.s32.totalorder %s843_s28, %s638_s25  ;;  %p647_p0 = scmp.lt.s32.totalorder %s638_s25, %s638_s25 }
  0x35   : > { %p641_p7 = pnand %p639_p5, %p599_p13  ;;  %p648_p2 = por %p647_p0, %p646_p12 }
  0x37   : > { %p642_p9 = pneg %p641_p7 }
  0x39   : > { %p649_p1 = pnand %p648_p2, %p642_p9 }
  0x3b   : > { %652 = shalt.err (!%p649_p1)
}
  0x3c   : > { %540 = dma.hbm_to_vmem [thread:$0]  (!%p839_p11), %s1030_s3, 256, %s843_s28, [#allocation6], %s757_s11, %s757_s11, %s758_s12  }
  0x3d   : > { %s898_s9 = sadd.s32 1, %s753_s18   ;;  %s28_s26 = sadd.s32 1, %s749_s17 }
  0x3e   : > { %s25_s10 = ssub.s32 %s753_s18, %s898_s9  ;;  %p35_p13 = scmp.ne.s32.totalorder %s749_s17, %s745_s16 }
  0x3f   : > { %p26_p6 = scmp.eq.s32.totalorder %s25_s10, 0  ;;  %p36_p10 = scmp.eq.s32.totalorder %s753_s18, 0 }
  0x40   : > { %p1039_p3 = scmp.eq.s32.totalorder %s809_s19, 1  ;;  %p551_p7 = scmp.lt.s32.totalorder %s753_s18, 2 }
  0x41   : > { %s914_s14 = scalar_select %p26_p6, %s749_s17, %s28_s26  }
  0x42   : > { %p908_p5 = por %p1039_p3, %p35_p13  ;;  %p37_p9 = por %p36_p10, %p35_p13 }
  0x43   : > { %s183_s20 = sand.u32 1, %s749_s17   ;;  %s483_s28 = sshll.u32 %s753_s18, 7 }
  0x44   : > { %s1040_s13 = scalar_select %p908_p5, 1, 0 }
  0x45   : > { %s482_s24 = sshll.u32 %s183_s20, 3  ;;  %s921_s27 = scalar_lea.hbm %s1027_s0, %s483_s28 }
  0x46   : > { %s187_s29 = scalar_lea.vmem [#allocation2], %s482_s24  ;;  %p925_p11 = pnand %p551_p7, %p37_p9 }
  0x47   : > { %s194_s30 = sshll.u32 %s187_s29, 4  ;;  %s184_s6 = scalar_lea.sflag [#allocation3], %s183_s20  ;;  %s923_s30 = int_to_ptr.vmem [resolvable:$true] %s194_s30 }
  0x48   : > { %s653_s25 = scalar_lea.hbm %s921_s27, 128  ;;  %p655_p0 = pneg %p925_p11 }
  0x49   : > { %p654_p12 = scmp.ne.s32.totalorder %s921_s27, %s653_s25  ;;  %s658_s26 = scalar_lea.hbm %s1027_s0, 256 }
  0x4a   : > { %p659_p13 = scmp.lt.u32.totalorder %s921_s27, %s1027_s0  ;;  %p660_p6 = scmp.lt.u32.totalorder %s658_s26, %s653_s25 }
  0x4b   : > { %p656_p2 = pnand %p655_p0, %p654_p12  ;;  %p662_p3 = scmp.lt.u32.totalorder %s653_s25, %s921_s27 }
  0x4c   : > { %p661_p10 = por %p660_p6, %p659_p13 }
  0x4d   : > { %p657_p1 = pneg %p656_p2 }
  0x4e   : > { %p663_p7 = por %p662_p3, %p661_p10 }
  0x50   : > { %p664_p9 = pnand %p663_p7, %p657_p1 }
  0x52   : > { %667 = shalt.err (!%p664_p9)
}
  0x53   : > { %s668_s20 = scalar_lea.vmem %s923_s30, 128  ;;  %s759_s28 = smov [#allocation2]  }
  0x54   : > { %p669_p12 = scmp.ne.s32.totalorder %s923_s30, %s668_s20  ;;  %s673_s11 = sshll.u32 %s759_s28, 4  ;;  %s674_s11 = int_to_ptr.vmem [resolvable:$false] %s673_s11 }
  0x55   : > { %s675_s12 = scalar_lea.vmem %s674_s11, 256  ;;  %p676_p4 = scmp.lt.s32.totalorder %s923_s30, %s674_s11 }
  0x56   : > { %p671_p2 = pnand %p669_p12, %p655_p0  ;;  %p677_p13 = scmp.lt.s32.totalorder %s675_s12, %s668_s20 }
  0x58   : > { %p672_p5 = pneg %p671_p2  ;;  %p678_p6 = por %p677_p13, %p676_p4 }
  0x5a   : > { %p679_p10 = pnand %p678_p6, %p672_p5 }
  0x5c   : > { %682 = shalt.err (!%p679_p10)
}
  0x5d   : > { %544 = dma.hbm_to_vmem [thread:$0]  (!%p925_p11), %s921_s27, 128, %s923_s30, %s184_s6  }
  0x5e   : > { %203 = sbr.rel (%p828_p8) target bundleno = 558 (0x22e), region = 36  ;;  %s957_s29 = sand.u32 (!%p828_p8), 1, %s745_s16  }
  0x5f   : > { %s485_s25 = sshll.u32 (!%p828_p8), %s957_s29, 3  ;;  %s206_s7 = scalar_lea.sflag (!%p828_p8), [#allocation3], %s957_s29 }
  0x60   : > { %s209_s8 = scalar_lea.vmem (!%p828_p8), [#allocation2], %s485_s25  ;;  %p1042_p4 = scmp.ne.s32.totalorder (!%p828_p8), %s1035_s21, 0 }
  0x65   : > { %728 = dma.done.wait (%p1042_p4), %s206_s7, 128  }
  0x66   : > { %730 = vsyncadd (%p1042_p4), %s206_s7, 4294967168  ;;  %p1043_p5 = scmp.eq.s32.totalorder %s809_s19, 0 }
  0x68   : > { %732 = dma.done.wait (%p1043_p5), [#allocation6], 512   ;;  %p1044_p8 = pmov %p1043_p5 }
  0x69   : > { %v760_v0 = vmov 0.0   ;;  %vm761_vm0 = vmmov 0   ;;  %v593_v1 = vld [vmem:[#allocation5] sm:$0xff]   ;;  %v594_v2 = vld [vmem:[#allocation5 + $0x8] sm:$0xff]   ;;  %v243_v3 = vld [vmem:[%s209_s8] sm:$0xff]  ;;  %vm269_vm1 = vcmask 261120  }
  0x6a   : > { %734 = vsyncadd (%p1044_p8), [#allocation6], 4294966784  ;;  %506 = vmatprep.subr.bf16.mxu0 %v760_v0  ;;  %510 = vmatprep.mubr.msk.bf16.mxu0 %vm761_vm0, %v760_v0  ;;  %v244_v4 = vmax.f32 %v243_v3, 0.0  ;;  %v595_v5 = vld [vmem:[#allocation7] sm:$0xff]   ;;  %v596_v7 = vld [vmem:[#allocation7 + $0x8] sm:$0xff]   ;;  %s497_s27 = sshll.u32 %s809_s19, 7 }
  0x6b   : > { %514 = vmatprep.subr.bf16.mxu1 %v760_v0  ;;  %518 = vmatprep.mubr.msk.bf16.mxu1 %vm761_vm0, %v760_v0  ;;  %v489_v8 = vld [vmem:[%s1029_s2] ss:$0 sm:$0xff]  ;;  %s241_s30 = scalar_lea.vmem [#allocation8], %s485_s25  ;;  %s982_s10 = scalar_lea.hbm %s1031_s4, %s497_s27 }
  0x6c   : > { %507 = vmatpush3.bf16.msra.mxu0 %v593_v1  ;;  %v245_v6 = vpack.c.bf16 %v244_v4, %v244_v4  ;;  %515 = vmatpush3.bf16.msra.mxu1 %v595_v5  ;;  %s388_s5 = sshll.u32 %s241_s30, 4  ;;  %s375_s24 = scalar_lea.sflag [#allocation4], %s957_s29  ;;  %s984_s5 = int_to_ptr.vmem [resolvable:$true] %s388_s5 }
  0x6d   : > { %508 = vmatprep.subr.bf16.mxu0 %v760_v0  ;;  %516 = vmatprep.subr.bf16.mxu1 %v760_v0  ;;  %s683_s19 = scalar_lea.vmem %s984_s5, 128  ;;  %p1045_p0 = scmp.ne.s32.totalorder %s1040_s13, 0 }
  0x6e   : > { %p684_p11 = scmp.ne.s32.totalorder %s984_s5, %s683_s19  ;;  %s762_s20 = smov [#allocation8]  }
  0x6f   : > { %s687_s28 = sshll.u32 %s762_s20, 4  ;;  %s688_s28 = int_to_ptr.vmem [resolvable:$false] %s687_s28 }
  0x70   : > { %509 = vmatpush3.bf16.msra.mxu0 %v594_v2  ;;  %517 = vmatpush3.bf16.msra.mxu1 %v596_v7  ;;  %p685_p1 = pnand %p684_p11, %p1045_p0  ;;  %s689_s11 = scalar_lea.vmem %s688_s28, 256 }
  0x71   : > { %p690_p7 = scmp.lt.s32.totalorder %s984_s5, %s688_s28  ;;  %p691_p9 = scmp.lt.s32.totalorder %s689_s11, %s683_s19 }
  0x72   : > { %p686_p3 = pneg %p685_p1 }
  0x73   : > { %511 = vmatmul.mubr.msk.bf16.vlgmr.msra.gmra.mrb[0].mxu0 %vm269_vm1, %v245_v6  ;;  %p692_p12 = por %p691_p9, %p690_p7 }
  0x75   : > { %p693_p2 = pnand %p692_p12, %p686_p3 }
 0x146   : > { %v307_v9 = vpop.f32.mrb[0].mxu0 }
 0x147   : > { %v308_v10 = vadd.f32 %v489_v8, %v307_v9  ;;  %v512_v11 = vpop.f32.mrb[1].mxu0 }
 0x148   : > { %v310_v12 = vpop.f32.mrb[2].mxu0 }
 0x149   : > { %v313_v13 = vpack.c.bf16 %v308_v10, %v308_v10  ;;  %v513_v14 = vpop.f32.mrb[3].mxu0 }
 0x14b   : > { %519 = vmatmul.mubr.msk.bf16.vlgmr.msra.gmra.mrb[0].mxu1 %vm269_vm1, %v313_v13 }
 0x21e   : > { %v367_v15 = vpop.f32.mrb[0].mxu1 }
 0x21f   : > { %373 = vst.msk [vmem:[%s241_s30] sm:$0xff] %vm269_vm1, %v367_v15  ;;  %v520_v16 = vpop.f32.mrb[1].mxu1 }
 0x220   : > { %v370_v17 = vpop.f32.mrb[2].mxu1 }
 0x221   : > { %696 = shalt.err (!%p693_p2)
}
 0x222   : > { %s697_s12 = scalar_lea.hbm %s982_s10, 128  ;;  %s701_s7 = scalar_lea.hbm %s1031_s4, 256 }
 0x223   : > { %p698_p13 = scmp.ne.s32.totalorder %s982_s10, %s697_s12  ;;  %p702_p4 = scmp.lt.u32.totalorder %s982_s10, %s1031_s4 }
 0x224   : > { %p703_p5 = scmp.lt.u32.totalorder %s701_s7, %s697_s12  ;;  %p705_p11 = scmp.lt.u32.totalorder %s697_s12, %s982_s10 }
 0x225   : > { %p699_p6 = pnand %p698_p13, %p1045_p0 }
 0x226   : > { %p704_p8 = por %p703_p5, %p702_p4 }
 0x227   : > { %p700_p10 = pneg %p699_p6 }
 0x228   : > { %p706_p1 = por %p705_p11, %p704_p8 }
 0x22a   : > { %p707_p3 = pnand %p706_p1, %p700_p10 }
 0x22c   : > { %710 = shalt.err (!%p707_p3)
}
 0x22d   : > { %532 = dma.vmem_to_hbm [thread:$0]  (%p1045_p0), %s984_s5, 128, %s982_s10, %s375_s24   ;;  %v521_v18 = vpop.f32.mrb[3].mxu1 }
 0x22e PF: > { %s400_s23 = sand.u32 1, %s741_s15   ;;  %p1046_p7 = scmp.ne.s32.totalorder %s1036_s22, 0 }
 0x22f   : > { %p1047_p9 = scmp.ge.s32.totalorder %s753_s18, 2  ;;  %s401_s27 = scalar_lea.sflag [#allocation4], %s400_s23 }
 0x231   : > { %p546_p12 = pnand %p1047_p9, %p1046_p7 }
 0x233   : > { %736 = dma.done.wait (!%p546_p12), %s401_s27, 128  }
 0x234   : > { %738 = vsyncadd (!%p546_p12), %s401_s27, 4294967168  ;;  %p18_p2 = scmp.ge.s32.totalorder %s898_s9, 4   ;;  %s1048_s15 = smov %s745_s16 }
 0x235   : > { %s1049_s16 = smov %s749_s17  ;;  %s1050_s17 = smov %s914_s14 }
 0x236   : > { %s1051_s18 = smov %s898_s9  ;;  %20 = sbr.rel (!%p18_p2) target bundleno = 6 (0x6), region = 89 }
 0x23d   :  { %406 = vsyncpa [#allocation3], 1 }
 0x23e   :  { %408 = vsyncpa [#allocation3 + $0x1], 1 }
 0x23f   :  { %409 = vsyncpa [#allocation6], 1 }
 0x240   :  { %410 = vsyncpa [#allocation4], 1 }
 0x241   :  { %412 = vsyncpa [#allocation4 + $0x1], 1 }

</bundles_post_ra>
